<compile_context>
chip_gen: v6e
topology: v6e:2x2x1
jax: 0.10.0
libtpu: 0.0.40
codegen_flags: <defaults>
</compile_context>

<pallas_src>
import functools

import jax
import jax.numpy as jnp
from jax.experimental import pallas as pl
from jax.experimental.pallas import tpu as pltpu

LANE = 128  # lane width / channel padding target


def _round_up(x, m):
    return ((x + m - 1) // m) * m


def _pad2(a, rows, cols):
    return jnp.pad(a, ((0, rows - a.shape[0]), (0, cols - a.shape[1])))


# --------------------------- fused small-graph path ---------------------------

def _gcn_fused_kernel(a_ref, x_ref, w1_ref, b1_ref, w2_ref, b2_ref, o_ref):
    """Both GCN layers in one body; everything VMEM-resident."""
    # Layer 1: relu((A @ X) @ W1 + b1)
    ax = jnp.dot(a_ref[...], x_ref[...], preferred_element_type=jnp.float32)
    h = jnp.dot(ax.astype(jnp.bfloat16), w1_ref[...],
                preferred_element_type=jnp.float32) + b1_ref[...]
    h = jnp.maximum(h, 0.0).astype(jnp.bfloat16)
    # Layer 2: (A @ H) @ W2 + b2
    ah = jnp.dot(a_ref[...], h, preferred_element_type=jnp.float32)
    out = jnp.dot(ah.astype(jnp.bfloat16), w2_ref[...],
                  preferred_element_type=jnp.float32) + b2_ref[...]
    o_ref[...] = out.astype(o_ref.dtype)


def _gcn_fused(a, x, w1, b1, w2, b2, *, out_dtype):
    n = a.shape[0]
    c_in = x.shape[1]
    hid = w1.shape[1]
    c_out = w2.shape[1]

    flops = 2 * n * n * c_in + 2 * n * c_in * hid + 2 * n * n * hid + 2 * n * hid * c_out
    bytes_accessed = int(a.size * a.dtype.itemsize + x.size * x.dtype.itemsize
                         + w1.size * w1.dtype.itemsize + b1.size * 4
                         + w2.size * w2.dtype.itemsize + b2.size * 4
                         + n * c_out * jnp.dtype(out_dtype).itemsize)

    return pl.pallas_call(
        _gcn_fused_kernel,
        out_shape=jax.ShapeDtypeStruct((n, c_out), out_dtype),
        grid=(1,),
        in_specs=[
            pl.BlockSpec((n, n), lambda i: (0, 0)),        # A_hat
            pl.BlockSpec((n, c_in), lambda i: (0, 0)),     # X
            pl.BlockSpec((c_in, hid), lambda i: (0, 0)),   # W1 (bf16)
            pl.BlockSpec((1, hid), lambda i: (0, 0)),      # b1 (f32)
            pl.BlockSpec((hid, c_out), lambda i: (0, 0)),  # W2 (bf16)
            pl.BlockSpec((1, c_out), lambda i: (0, 0)),    # b2 (f32)
        ],
        out_specs=pl.BlockSpec((n, c_out), lambda i: (0, 0)),
        compiler_params=pltpu.CompilerParams(
            dimension_semantics=("arbitrary",),
            vmem_limit_bytes=64 * 1024 * 1024,
        ),
        cost_estimate=pl.CostEstimate(
            flops=flops, transcendentals=0, bytes_accessed=bytes_accessed),
    )(a, x, w1, b1, w2, b2)


# ----------------------------- tiled per-layer path ---------------------------

def _gcn_layer_kernel(a_ref, x_ref, w_ref, b_ref, o_ref, acc_ref, *,
                      relu, tk, x_resident):
    """One GCNConv layer:  out = (A @ X) @ W + b  (optionally relu'd).

    Grid = (row blocks [parallel], K blocks [arbitrary]).  The K axis
    accumulates A @ X into an f32 VMEM scratch; the small bf16 @W + bias
    (+ relu) epilogue runs on the last K step.
    """
    k = pl.program_id(1)

    @pl.when(k == 0)
    def _():
        acc_ref[...] = jnp.zeros_like(acc_ref)

    if x_resident:
        start = pl.multiple_of(k * tk, tk)
        x_blk = x_ref[pl.ds(start, tk), :]
    else:
        x_blk = x_ref[...]

    # bf16 x bf16 -> f32 accumulate on the MXU.
    acc_ref[...] += jnp.dot(a_ref[...], x_blk,
                            preferred_element_type=jnp.float32)

    @pl.when(k == pl.num_programs(1) - 1)
    def _():
        h = jnp.dot(acc_ref[...].astype(w_ref.dtype), w_ref[...],
                    preferred_element_type=jnp.float32) + b_ref[...]
        if relu:
            h = jnp.maximum(h, 0.0)
        o_ref[...] = h.astype(o_ref.dtype)


def _gcn_layer(a, feats, w, b, *, relu, out_dtype, tm, tk,
               x_resident_budget_bytes=24 * 1024 * 1024):
    """Tiled pallas_call for one layer. All shapes already padded."""
    n = a.shape[0]
    f_in = feats.shape[1]
    f_out = w.shape[1]
    assert n % tm == 0 and n % tk == 0
    assert f_in % LANE == 0 and f_out % LANE == 0

    x_bytes = feats.size * feats.dtype.itemsize
    # Conservatively count 2x (pipeline may double-buffer the resident slab).
    x_resident = 2 * x_bytes <= x_resident_budget_bytes

    grid = (n // tm, n // tk)

    if x_resident:
        # Constant block index -> the whole feature slab is DMA'd once and
        # stays VMEM-resident for the entire call (no per-row-block re-stream).
        x_spec = pl.BlockSpec((n, f_in), lambda i, k: (0, 0))
        x_reads = 1
    else:
        x_spec = pl.BlockSpec((tk, f_in), lambda i, k: (k, 0))
        x_reads = n // tm

    out_itemsize = jnp.dtype(out_dtype).itemsize

    # Double-buffered VMEM footprint -> scoped limit (capped for v7x's 64 MiB).
    a_vm = 2 * tm * tk * a.dtype.itemsize
    x_vm = (2 * x_bytes) if x_resident else (2 * tk * f_in * feats.dtype.itemsize)
    w_vm = 2 * w.size * w.dtype.itemsize
    o_vm = 2 * tm * f_out * out_itemsize
    acc_vm = tm * f_in * 4
    footprint = a_vm + x_vm + w_vm + o_vm + acc_vm + 2 * b.size * 4
    vmem_limit = int(min(max(2 * footprint, 32 * 1024 * 1024), 56 * 1024 * 1024))

    flops = 2 * n * n * f_in + 2 * n * f_in * f_out
    bytes_accessed = int(
        a.size * a.dtype.itemsize
        + x_reads * x_bytes
        + w.size * w.dtype.itemsize + b.size * 4
        + n * f_out * out_itemsize
    )

    return pl.pallas_call(
        functools.partial(_gcn_layer_kernel, relu=relu, tk=tk,
                          x_resident=x_resident),
        out_shape=jax.ShapeDtypeStruct((n, f_out), out_dtype),
        grid_spec=pltpu.PrefetchScalarGridSpec(
            num_scalar_prefetch=0,
            grid=grid,
            in_specs=[
                pl.BlockSpec((tm, tk), lambda i, k: (i, k)),   # A block
                x_spec,                                        # X (resident/slab)
                pl.BlockSpec((f_in, f_out), lambda i, k: (0, 0)),  # W (bf16)
                pl.BlockSpec((1, f_out), lambda i, k: (0, 0)),     # bias (f32)
            ],
            out_specs=pl.BlockSpec((tm, f_out), lambda i, k: (i, 0)),
            scratch_shapes=[pltpu.VMEM((tm, f_in), jnp.float32)],
        ),
        compiler_params=pltpu.CompilerParams(
            dimension_semantics=("parallel", "arbitrary"),
            vmem_limit_bytes=vmem_limit,
        ),
        cost_estimate=pl.CostEstimate(
            flops=flops, transcendentals=0, bytes_accessed=bytes_accessed),
    )(a, feats, w, b)


# --------------------------------- full module --------------------------------

def gnn_forward(a_hat, x, w1, b1, w2, b2, *, force_tiled=False):
    """Full module: GCN2(relu(GCN1(x))) with lane-dense padding + bf16 streams."""
    n = x.shape[0]
    c_out = w2.shape[1]

    # Decoupled row / reduction tiles (used by the tiled path) and node padding.
    n128 = _round_up(max(n, LANE), LANE)
    tm = min(512, n128)
    n_pad = _round_up(n, tm)
    tk = tm
    for cand in (1024, 512, 256):
        if cand <= n_pad and n_pad % cand == 0:
            tk = cand
            break

    c_in_p = _round_up(x.shape[1], LANE)
    hid_p = _round_up(w1.shape[1], LANE)
    c_out_p = _round_up(c_out, LANE)

    # bf16 for the streamed / MXU operands; biases stay f32 (added post-matmul).
    a_p = _pad2(a_hat, n_pad, n_pad).astype(jnp.bfloat16)
    x_p = _pad2(x, n_pad, c_in_p).astype(jnp.bfloat16)
    w1_p = _pad2(w1, c_in_p, hid_p).astype(jnp.bfloat16)
    b1_p = _pad2(b1, 1, hid_p).astype(jnp.float32)
    w2_p = _pad2(w2, hid_p, c_out_p).astype(jnp.bfloat16)
    b2_p = _pad2(b2, 1, c_out_p).astype(jnp.float32)

    if (not force_tiled) and n_pad <= 1024:
        # Small graph: single fused call, everything VMEM-resident.
        out = _gcn_fused(a_p, x_p, w1_p, b1_p, w2_p, b2_p, out_dtype=jnp.float32)
    else:
        # Layer 1: relu(A @ X @ W1 + b1), H kept in bf16 for the next stream.
        h = _gcn_layer(a_p, x_p, w1_p, b1_p,
                       relu=True, out_dtype=jnp.bfloat16, tm=tm, tk=tk)
        # Layer 2: A @ H @ W2 + b2, final result in f32.
        out = _gcn_layer(a_p, h, w2_p, b2_p,
                         relu=False, out_dtype=jnp.float32, tm=tm, tk=tk)
    return out[:n, :c_out]


def build_gcn_adj(edge_index, num_nodes):
    """Dense normalized adjacency with self-loops (PyG gcn_norm semantics)."""
    src, dst = edge_index[0], edge_index[1]
    loop = jnp.arange(num_nodes, dtype=src.dtype)
    src = jnp.concatenate([src, loop])
    dst = jnp.concatenate([dst, loop])
    w = jnp.ones(src.shape[0], dtype=jnp.float32)
    deg = jnp.zeros(num_nodes, dtype=jnp.float32).at[dst].add(w)
    dinv = jnp.where(deg > 0, 1.0 / jnp.sqrt(deg), 0.0)
    norm = dinv[src] * w * dinv[dst]
    # out[dst] += norm * x[src]  <=>  A_hat[dst, src] = norm
    a_hat = jnp.zeros((num_nodes, num_nodes), dtype=jnp.float32)
    a_hat = a_hat.at[dst, src].add(norm)
    return a_hat


def glorot(key, shape):
    fan_in, fan_out = shape
    limit = jnp.sqrt(6.0 / (fan_in + fan_out))
    return jax.random.uniform(key, shape, jnp.float32, -limit, limit)


if __name__ == "__main__":
    key = jax.random.PRNGKey(0)
    k_x, k_e, k_w1, k_w2 = jax.random.split(key, 4)

    N = 200          # number of nodes (exercises node padding to 256)
    C_IN = 8         # in_channels
    HIDDEN = 16      # GCNConv hidden width (fixed at 16 in the module)
    C_OUT = 8        # out_channels
    E = 800          # number of edges

    # Deterministic inputs
    x = jax.random.normal(k_x, (N, C_IN), dtype=jnp.float32)
    edge_index = jax.random.randint(k_e, (2, E), 0, N, dtype=jnp.int32)

    # Deterministic parameters (glorot weights, zero biases — PyG defaults)
    w1 = glorot(k_w1, (C_IN, HIDDEN))
    b1 = jnp.zeros((1, HIDDEN), dtype=jnp.float32)
    w2 = glorot(k_w2, (HIDDEN, C_OUT))
    b2 = jnp.zeros((1, C_OUT), dtype=jnp.float32)

    a_hat = build_gcn_adj(edge_index, N)

    # Pure-JAX reference with the same bf16 casts applied to the MXU operands;
    # accumulation in f32 just like the kernels.
    def _bf(v):
        return v.astype(jnp.bfloat16).astype(jnp.float32)

    ax_ref = _bf(a_hat) @ _bf(x)
    h_ref = jnp.maximum(_bf(ax_ref) @ _bf(w1) + b1, 0.0)
    ah_ref = _bf(a_hat) @ _bf(h_ref)
    ref = _bf(ah_ref) @ _bf(w2) + b2

    # Fused small-graph path (used for this demo size).
    out_fused = jax.block_until_ready(gnn_forward(a_hat, x, w1, b1, w2, b2))
    # Tiled per-layer path (what large graphs would take) — also verified.
    out_tiled = jax.block_until_ready(
        gnn_forward(a_hat, x, w1, b1, w2, b2, force_tiled=True))

    assert out_fused.shape == (N, C_OUT)
    assert out_tiled.shape == (N, C_OUT)
    assert jnp.allclose(out_fused, ref, atol=2e-2, rtol=2e-2), "fused mismatch"
    assert jnp.allclose(out_tiled, ref, atol=2e-2, rtol=2e-2), "tiled mismatch"

    print("KERNEL_OK")
</pallas_src>

<mosaic_0001>
module attributes {stable_mosaic.version = 11 : i64} {
  func.func @_gcn_fused_kernel(%arg0: i32, %arg1: memref<256x256xbf16, #tpu.memory_space<vmem>>, %arg2: memref<256x128xbf16, #tpu.memory_space<vmem>>, %arg3: memref<128x128xbf16, #tpu.memory_space<vmem>>, %arg4: memref<1x128xf32, #tpu.memory_space<vmem>>, %arg5: memref<128x128xbf16, #tpu.memory_space<vmem>>, %arg6: memref<1x128xf32, #tpu.memory_space<vmem>>, %arg7: memref<256x128xf32, #tpu.memory_space<vmem>>) attributes {dimension_semantics = [#tpu.dimension_semantics<arbitrary>], iteration_bounds = array<i64: 1>, scalar_prefetch = 0 : i64, scratch_operands = 0 : i64, tpu.core_type = #tpu.core_type<tc>, window_params = [{pipeline_mode = #tpu.pipeline_mode<synchronous>, transform_indices = @transform_0, window_bounds = array<i64: 256, 256>}, {pipeline_mode = #tpu.pipeline_mode<synchronous>, transform_indices = @transform_1, window_bounds = array<i64: 256, 128>}, {pipeline_mode = #tpu.pipeline_mode<synchronous>, transform_indices = @transform_2, window_bounds = array<i64: 128, 128>}, {pipeline_mode = #tpu.pipeline_mode<synchronous>, transform_indices = @transform_3, window_bounds = array<i64: 1, 128>}, {pipeline_mode = #tpu.pipeline_mode<synchronous>, transform_indices = @transform_4, window_bounds = array<i64: 128, 128>}, {pipeline_mode = #tpu.pipeline_mode<synchronous>, transform_indices = @transform_5, window_bounds = array<i64: 1, 128>}, {pipeline_mode = #tpu.pipeline_mode<synchronous>, transform_indices = @transform_6, window_bounds = array<i64: 256, 128>}]} {
    %c0 = arith.constant 0 : index
    %c0_0 = arith.constant 0 : index
    %0 = vector.load %arg1[%c0, %c0_0] : memref<256x256xbf16, #tpu.memory_space<vmem>>, vector<256x256xbf16>
    %c0_1 = arith.constant 0 : index
    %c0_2 = arith.constant 0 : index
    %1 = vector.load %arg2[%c0_1, %c0_2] : memref<256x128xbf16, #tpu.memory_space<vmem>>, vector<256x128xbf16>
    %cst = arith.constant dense<0.000000e+00> : vector<256x128xf32>
    %2 = tpu.matmul %0, %1, %cst {dimension_numbers = #tpu.dot_dimension_numbers<[1], [0], [0], [1], [0, 0, 1, 1], [], []>} : vector<256x256xbf16>, vector<256x128xbf16>, vector<256x128xf32> -> vector<256x128xf32>
    %3 = arith.truncf %2 : vector<256x128xf32> to vector<256x128xbf16>
    %c0_3 = arith.constant 0 : index
    %c0_4 = arith.constant 0 : index
    %4 = vector.load %arg3[%c0_3, %c0_4] : memref<128x128xbf16, #tpu.memory_space<vmem>>, vector<128x128xbf16>
    %cst_5 = arith.constant dense<0.000000e+00> : vector<256x128xf32>
    %5 = tpu.matmul %3, %4, %cst_5 {dimension_numbers = #tpu.dot_dimension_numbers<[1], [0], [0], [1], [0, 0, 1, 1], [], []>} : vector<256x128xbf16>, vector<128x128xbf16>, vector<256x128xf32> -> vector<256x128xf32>
    %c0_6 = arith.constant 0 : index
    %c0_7 = arith.constant 0 : index
    %6 = vector.load %arg4[%c0_6, %c0_7] : memref<1x128xf32, #tpu.memory_space<vmem>>, vector<1x128xf32>
    %7 = vector.broadcast %6 : vector<1x128xf32> to vector<256x128xf32>
    %8 = arith.addf %5, %7 : vector<256x128xf32>
    %cst_8 = arith.constant 0.000000e+00 : f32
    %9 = vector.broadcast %cst_8 : f32 to vector<256x128xf32>
    %10 = arith.maximumf %8, %9 : vector<256x128xf32>
    %11 = arith.truncf %10 : vector<256x128xf32> to vector<256x128xbf16>
    %c0_9 = arith.constant 0 : index
    %c0_10 = arith.constant 0 : index
    %12 = vector.load %arg1[%c0_9, %c0_10] : memref<256x256xbf16, #tpu.memory_space<vmem>>, vector<256x256xbf16>
    %cst_11 = arith.constant dense<0.000000e+00> : vector<256x128xf32>
    %13 = tpu.matmul %12, %11, %cst_11 {dimension_numbers = #tpu.dot_dimension_numbers<[1], [0], [0], [1], [0, 0, 1, 1], [], []>} : vector<256x256xbf16>, vector<256x128xbf16>, vector<256x128xf32> -> vector<256x128xf32>
    %14 = arith.truncf %13 : vector<256x128xf32> to vector<256x128xbf16>
    %c0_12 = arith.constant 0 : index
    %c0_13 = arith.constant 0 : index
    %15 = vector.load %arg5[%c0_12, %c0_13] : memref<128x128xbf16, #tpu.memory_space<vmem>>, vector<128x128xbf16>
    %cst_14 = arith.constant dense<0.000000e+00> : vector<256x128xf32>
    %16 = tpu.matmul %14, %15, %cst_14 {dimension_numbers = #tpu.dot_dimension_numbers<[1], [0], [0], [1], [0, 0, 1, 1], [], []>} : vector<256x128xbf16>, vector<128x128xbf16>, vector<256x128xf32> -> vector<256x128xf32>
    %c0_15 = arith.constant 0 : index
    %c0_16 = arith.constant 0 : index
    %17 = vector.load %arg6[%c0_15, %c0_16] : memref<1x128xf32, #tpu.memory_space<vmem>>, vector<1x128xf32>
    %18 = vector.broadcast %17 : vector<1x128xf32> to vector<256x128xf32>
    %19 = arith.addf %16, %18 : vector<256x128xf32>
    %c0_17 = arith.constant 0 : index
    %c0_18 = arith.constant 0 : index
    %20 = vector.load %arg7[%c0_17, %c0_18] : memref<256x128xf32, #tpu.memory_space<vmem>>, vector<256x128xf32>
    tpu.vector_store %arg7[%c0_17, %c0_18], %19 {strides = array<i32>} : memref<256x128xf32, #tpu.memory_space<vmem>>, vector<256x128xf32>,
    return
  }
  func.func @transform_0(%arg0: i32) -> (i32, i32) {
    %c0_i32 = arith.constant 0 : i32
    %c0_i32_0 = arith.constant 0 : i32
    %c0_i32_1 = arith.constant 0 : i32
    return %c0_i32, %c0_i32_0 : i32, i32
  }
  func.func @transform_1(%arg0: i32) -> (i32, i32) {
    %c0_i32 = arith.constant 0 : i32
    %c0_i32_0 = arith.constant 0 : i32
    %c0_i32_1 = arith.constant 0 : i32
    return %c0_i32, %c0_i32_0 : i32, i32
  }
  func.func @transform_2(%arg0: i32) -> (i32, i32) {
    %c0_i32 = arith.constant 0 : i32
    %c0_i32_0 = arith.constant 0 : i32
    %c0_i32_1 = arith.constant 0 : i32
    return %c0_i32, %c0_i32_0 : i32, i32
  }
  func.func @transform_3(%arg0: i32) -> (i32, i32) {
    %c0_i32 = arith.constant 0 : i32
    %c0_i32_0 = arith.constant 0 : i32
    %c0_i32_1 = arith.constant 0 : i32
    return %c0_i32, %c0_i32_0 : i32, i32
  }
  func.func @transform_4(%arg0: i32) -> (i32, i32) {
    %c0_i32 = arith.constant 0 : i32
    %c0_i32_0 = arith.constant 0 : i32
    %c0_i32_1 = arith.constant 0 : i32
    return %c0_i32, %c0_i32_0 : i32, i32
  }
  func.func @transform_5(%arg0: i32) -> (i32, i32) {
    %c0_i32 = arith.constant 0 : i32
    %c0_i32_0 = arith.constant 0 : i32
    %c0_i32_1 = arith.constant 0 : i32
    return %c0_i32, %c0_i32_0 : i32, i32
  }
  func.func @transform_6(%arg0: i32) -> (i32, i32) {
    %c0_i32 = arith.constant 0 : i32
    %c0_i32_0 = arith.constant 0 : i32
    %c0_i32_1 = arith.constant 0 : i32
    return %c0_i32, %c0_i32_0 : i32, i32
  }
}

</mosaic_0001>

<bundles_post_ra>
// kernel: tpu_custom_call.1
= control target key start
LH: loop header
LB: loop body
LE: loop exit
PB: predicated region body
PF: predicated region fallthrough
CT: control target
= control target key end

     0   :  { %11 = vsyncpa [#allocation3], 0  ;;  %s2248_s0 = inlined_call_operand.hbm [shape: bf16[256,256], index: 0, kind: input, shape index: {}]   ;;  %s2249_s1 = inlined_call_operand.hbm [shape: bf16[256,128], index: 1, kind: input, shape index: {}]   ;;  %s2250_s2 = inlined_call_operand.hbm [shape: bf16[128,128], index: 2, kind: input, shape index: {}]   ;;  %s2251_s3 = inlined_call_operand.vmem [shape: f32[1,128], index: 3, kind: input, shape index: {}]   ;;  %s2252_s4 = inlined_call_operand.hbm [shape: bf16[128,128], index: 4, kind: input, shape index: {}]   ;;  %s2253_s5 = inlined_call_operand.vmem [shape: f32[1,128], index: 5, kind: input, shape index: {}]   ;;  %s2254_s6 = inlined_call_operand.hbm [shape: f32[256,128], index: 6, kind: output, shape index: {}]  }
   0x1   :  { %12 = vsyncpa [#allocation6], 0 }
   0x2   :  { %13 = vsyncpa [#allocation9], 0 }
   0x3   :  { %14 = vsyncpa [#allocation4], 0  ;;  %s1948_s21 = smov [#allocation5]  }
   0x4   :  { %s32_s22 = sshll.u32 %s1948_s21, 4  ;;  %s33_s22 = int_to_ptr.vmem [resolvable:$true] %s32_s22 }
   0x5   :  { %s1848_s23 = scalar_lea.vmem %s33_s22, 2048  ;;  %p1853_p1 = scmp.lt.s32.totalorder %s33_s22, %s33_s22 }
   0x6   :  { %p1849_p0 = scmp.ne.s32.totalorder %s33_s22, %s1848_s23  ;;  %p1854_p2 = scmp.lt.s32.totalorder %s1848_s23, %s1848_s23 }
   0x8   :  { %p1855_p3 = por %p1854_p2, %p1853_p1 }
   0xa   :  { %p1856_p4 = pnand %p1855_p3, %p1849_p0 }
   0xc   :  { %1859 = shalt.err (!%p1856_p4)
}
   0xd   :  { %s1949_s24 = smov 64   ;;  %s1950_s25 = smov 4  }
   0xe   :  { %38 = dma.hbm_to_vmem [thread:$0]  %s2249_s1, 2048, %s33_s22, [#allocation6], %s1949_s24, %s1949_s24, %s1950_s25  }
   0xf   :  { %s1951_s28 = smov [#allocation2]  }
  0x10   :  { %s20_s29 = sshll.u32 %s1951_s28, 4  ;;  %s21_s29 = int_to_ptr.vmem [resolvable:$true] %s20_s29 }
  0x11   :  { %s1868_s30 = scalar_lea.vmem %s21_s29, 4096  ;;  %p1873_p6 = scmp.lt.s32.totalorder %s21_s29, %s21_s29 }
  0x12   :  { %p1869_p5 = scmp.ne.s32.totalorder %s21_s29, %s1868_s30  ;;  %p1874_p7 = scmp.lt.s32.totalorder %s1868_s30, %s1868_s30 }
  0x14   :  { %p1875_p8 = por %p1874_p7, %p1873_p6 }
  0x16   :  { %p1876_p9 = pnand %p1875_p8, %p1869_p5 }
  0x18   :  { %1879 = shalt.err (!%p1876_p9)
}
  0x19   :  { %s1952_s7 = smov 128   ;;  %s1953_s8 = smov 8  }
  0x1a   :  { %26 = dma.hbm_to_vmem [thread:$0]  %s2248_s0, 4096, %s21_s29, [#allocation3], %s1952_s7, %s1952_s7, %s1953_s8  }
  0x1b   :  { %s1954_s1 = smov [#allocation7]   ;;  %s1955_s12 = smov [#allocation8]  }
  0x1c   :  { %s44_s11 = sshll.u32 %s1954_s1, 4  ;;  %s58_s13 = sshll.u32 %s1955_s12, 4  ;;  %s45_s11 = int_to_ptr.vmem [resolvable:$true] %s44_s11  ;;  %s59_s13 = int_to_ptr.vmem [resolvable:$true] %s58_s13 }
  0x1d   :  { %s1888_s14 = scalar_lea.vmem %s45_s11, 1024  ;;  %p1893_p11 = scmp.lt.s32.totalorder %s45_s11, %s45_s11 }
  0x1e   :  { %p1889_p10 = scmp.ne.s32.totalorder %s45_s11, %s1888_s14  ;;  %p1894_p12 = scmp.lt.s32.totalorder %s1888_s14, %s1888_s14 }
  0x20   :  { %p1895_p13 = por %p1894_p12, %p1893_p11 }
  0x22   :  { %p1896_p0 = pnand %p1895_p13, %p1889_p10 }
  0x24   :  { %1899 = shalt.err (!%p1896_p0)
}
  0x25   :  { %50 = dma.hbm_to_vmem [thread:$0]  %s2250_s2, 1024, %s45_s11, [#allocation6], %s1949_s24, %s1949_s24, %s1950_s25  }
  0x26   :  { %s1908_s0 = scalar_lea.vmem %s59_s13, 1024  ;;  %p1913_p2 = scmp.lt.s32.totalorder %s59_s13, %s59_s13 }
  0x27   :  { %p1909_p1 = scmp.ne.s32.totalorder %s59_s13, %s1908_s0  ;;  %p1914_p3 = scmp.lt.s32.totalorder %s1908_s0, %s1908_s0 }
  0x29   :  { %p1915_p4 = por %p1914_p3, %p1913_p2 }
  0x2b   :  { %p1916_p5 = pnand %p1915_p4, %p1909_p1 }
  0x2d   :  { %1919 = shalt.err (!%p1916_p5)
}
  0x2e   :  { %64 = dma.hbm_to_vmem [thread:$0]  %s2252_s4, 1024, %s59_s13, [#allocation9], %s1949_s24, %s1949_s24, %s1950_s25  }
  0x2f   :  { %1940 = dma.done.wait [#allocation3], 4096  }
  0x30   :  { %1941 = vsyncadd [#allocation3], 4294963200 }
  0x31   :  { %1942 = dma.done.wait [#allocation6], 3072  }
  0x32   :  { %1943 = vsyncadd [#allocation6], 4294964224 }
  0x33   :  { %1944 = dma.done.wait [#allocation9], 1024  }
  0x34   :  { %1945 = vsyncadd [#allocation9], 4294966272  ;;  %v1760_v0 = vld [vmem:[#allocation5 + $0x78] sm:$0xff]   ;;  %v1762_v2 = vld [vmem:[#allocation5 + $0x70] sm:$0xff]  }
  0x35   :  { %v1761_v1 = vld [vmem:[#allocation5 + $0x38] sm:$0xff]   ;;  %1383 = vmatprep.subr.bf16.mxu0 %v1760_v0  ;;  %v1763_v3 = vld [vmem:[#allocation5 + $0x30] sm:$0xff]   ;;  %v1764_v4 = vld [vmem:[#allocation5 + $0x68] sm:$0xff]  }
  0x36   :  { %1384 = vmatpush3.bf16.msra.mxu0 %v1761_v1  ;;  %v1765_v5 = vld [vmem:[#allocation5 + $0x28] sm:$0xff]   ;;  %v1766_v6 = vld [vmem:[#allocation5 + $0x60] sm:$0xff]   ;;  %v1768_v8 = vld [vmem:[#allocation5 + $0x58] sm:$0xff]  }
  0x37   :  { %1385 = vmatprep.subr.bf16.mxu0 %v1762_v2  ;;  %v1767_v7 = vld [vmem:[#allocation5 + $0x20] sm:$0xff]   ;;  %v1769_v9 = vld [vmem:[#allocation5 + $0x18] sm:$0xff]   ;;  %v1770_v10 = vld [vmem:[#allocation5 + $0x50] sm:$0xff]  }
  0x38   :  { %v2016_v11 = vld [vmem:[#allocation2 + $0x4] ss:$8 sps:$4 sm:$0xff]   ;;  %v1771_v12 = vld [vmem:[#allocation5 + $0x10] sm:$0xff]   ;;  %v2019_v17 = vld [vmem:[#allocation2] ss:$8 sps:$4 sm:$0xff]  }
  0x39   :  { %432 = vmatprep.mubr.bf16.mxu0 %v2016_v11  ;;  %v1772_v13 = vld [vmem:[#allocation5 + $0x48] sm:$0xff]   ;;  %v1774_v15 = vld [vmem:[#allocation5 + $0x40] sm:$0xff]   ;;  %v2021_v18 = vld [vmem:[#allocation2 + $0x14] ss:$8 sps:$4 sm:$0xff]  }
  0x3a   :  { %1386 = vmatpush3.bf16.msra.mxu0 %v1763_v3  ;;  %v1773_v14 = vld [vmem:[#allocation5 + $0x8] sm:$0xff]   ;;  %v1775_v16 = vld [vmem:[#allocation5] sm:$0xff]   ;;  %v2025_v19 = vld [vmem:[#allocation2 + $0x10] ss:$8 sps:$4 sm:$0xff]  }
  0x3b   :  { %1387 = vmatprep.subr.bf16.mxu0 %v1764_v4  ;;  %v2027_v20 = vld [vmem:[#allocation2 + $0x24] ss:$8 sps:$4 sm:$0xff]   ;;  %v1824_v21 = vld [vmem:[#allocation7 + $0x38] sm:$0xff]   ;;  %v1825_v22 = vld [vmem:[#allocation7 + $0x30] sm:$0xff]  }
  0x3c   :  { %1655 = vmatprep.subr.bf16.mxu1 %v1824_v21  ;;  %v1826_v23 = vld [vmem:[#allocation7 + $0x28] sm:$0xff]   ;;  %v1827_v25 = vld [vmem:[#allocation7 + $0x20] sm:$0xff]   ;;  %v2033_v26 = vld [vmem:[#allocation2 + $0x34] ss:$8 sps:$4 sm:$0xff]  }
  0x3d   :  { %1656 = vmatpush3.bf16.msra.mxu1 %v1824_v21  ;;  %v2031_v24 = vld [vmem:[#allocation2 + $0x20] ss:$8 sps:$4 sm:$0xff]   ;;  %v2037_v27 = vld [vmem:[#allocation2 + $0x30] ss:$8 sps:$4 sm:$0xff]   ;;  %v2039_v28 = vld [vmem:[#allocation2 + $0x44] ss:$8 sps:$4 sm:$0xff]  }
  0x3e   :  { %1388 = vmatpush3.bf16.msra.mxu0 %v1765_v5  ;;  %1657 = vmatprep.subr.bf16.mxu1 %v1825_v22  ;;  %v2043_v29 = vld [vmem:[#allocation2 + $0x40] ss:$8 sps:$4 sm:$0xff]   ;;  %v2045_v30 = vld [vmem:[#allocation2 + $0x54] ss:$8 sps:$4 sm:$0xff]   ;;  %v2049_v31 = vld [vmem:[#allocation2 + $0x50] ss:$8 sps:$4 sm:$0xff]  }
  0x3f   :  { %1389 = vmatprep.subr.bf16.mxu0 %v1766_v6  ;;  %v2051_v32 = vld [vmem:[#allocation2 + $0x64] ss:$8 sps:$4 sm:$0xff]   ;;  %v2055_v33 = vld [vmem:[#allocation2 + $0x60] ss:$8 sps:$4 sm:$0xff]   ;;  %v2057_v34 = vld [vmem:[#allocation2 + $0x74] ss:$8 sps:$4 sm:$0xff]  }
  0x40   :  { %v2061_v35 = vld [vmem:[#allocation2 + $0x70] ss:$8 sps:$4 sm:$0xff]   ;;  %v2063_v36 = vld [vmem:[#allocation2 + $0x84] ss:$8 sps:$4 sm:$0xff]   ;;  %v2067_v37 = vld [vmem:[#allocation2 + $0x80] ss:$8 sps:$4 sm:$0xff]  }
  0x41   :  { %1658 = vmatpush3.bf16.msra.mxu1 %v1825_v22  ;;  %v2069_v38 = vld [vmem:[#allocation2 + $0x94] ss:$8 sps:$4 sm:$0xff]   ;;  %v2073_v40 = vld [vmem:[#allocation2 + $0x90] ss:$8 sps:$4 sm:$0xff]   ;;  %v2075_v41 = vld [vmem:[#allocation2 + $0xa4] ss:$8 sps:$4 sm:$0xff]  }
  0x42   :  { %1390 = vmatpush3.bf16.msra.mxu0 %v1767_v7  ;;  %1659 = vmatprep.subr.bf16.mxu1 %v1826_v23  ;;  %v1828_v39 = vld [vmem:[#allocation7 + $0x18] sm:$0xff]   ;;  %v1829_v42 = vld [vmem:[#allocation7 + $0x10] sm:$0xff]   ;;  %v1830_v43 = vld [vmem:[#allocation7 + $0x8] sm:$0xff]  }
  0x43   :  { %1391 = vmatprep.subr.bf16.mxu0 %v1768_v8  ;;  %v2079_v44 = vld [vmem:[#allocation2 + $0xa0] ss:$8 sps:$4 sm:$0xff]   ;;  %v2081_v45 = vld [vmem:[#allocation2 + $0xb4] ss:$8 sps:$4 sm:$0xff]   ;;  %v2085_v47 = vld [vmem:[#allocation2 + $0xb0] ss:$8 sps:$4 sm:$0xff]  }
  0x44   :  { %2266 = vst [vmem:[#allocation15_spill] sm:$0xff] %v2079_v44  ;;  %2267 = vst [vmem:[#allocation16_spill] sm:$0xff] %v2081_v45  ;;  %v1831_v46 = vld [vmem:[#allocation7] sm:$0xff]   ;;  %v2093_v50 = vld [vmem:[#allocation2 + $0xd4] ss:$8 sps:$4 sm:$0xff]  }
  0x45   :  { %1660 = vmatpush3.bf16.msra.mxu1 %v1826_v23  ;;  %2268 = vst [vmem:[#allocation17_spill] sm:$0xff] %v2085_v47  ;;  %v2087_v48 = vld [vmem:[#allocation2 + $0xc4] ss:$8 sps:$4 sm:$0xff]   ;;  %v2091_v49 = vld [vmem:[#allocation2 + $0xc0] ss:$8 sps:$4 sm:$0xff]   ;;  %2271 = vst [vmem:[#allocation20_spill] sm:$0xff] %v2093_v50 }
  0x46   :  { %1392 = vmatpush3.bf16.msra.mxu0 %v1769_v9  ;;  %1661 = vmatprep.subr.bf16.mxu1 %v1827_v25  ;;  %2269 = vst [vmem:[#allocation18_spill] sm:$0xff] %v2087_v48  ;;  %2270 = vst [vmem:[#allocation19_spill] sm:$0xff] %v2091_v49  ;;  %v2097_v51 = vld [vmem:[#allocation2 + $0xd0] ss:$8 sps:$4 sm:$0xff]   ;;  %v2099_v52 = vld [vmem:[#allocation2 + $0xe4] ss:$8 sps:$4 sm:$0xff]  }
  0x47   :  { %1393 = vmatprep.subr.bf16.mxu0 %v1770_v10  ;;  %2272 = vst [vmem:[#allocation21_spill] sm:$0xff] %v2097_v51  ;;  %2273 = vst [vmem:[#allocation22_spill] sm:$0xff] %v2099_v52  ;;  %v2103_v53 = vld [vmem:[#allocation2 + $0xe0] ss:$8 sps:$4 sm:$0xff]   ;;  %v2105_v54 = vld [vmem:[#allocation2 + $0xf4] ss:$8 sps:$4 sm:$0xff]  }
  0x48   :  { %2274 = vst [vmem:[#allocation23_spill] sm:$0xff] %v2103_v53  ;;  %2275 = vst [vmem:[#allocation24_spill] sm:$0xff] %v2105_v54  ;;  %v2109_v55 = vld [vmem:[#allocation2 + $0xf0] ss:$8 sps:$4 sm:$0xff]  }
  0x49   :  { %1662 = vmatpush3.bf16.msra.mxu1 %v1827_v25  ;;  %2276 = vst [vmem:[#allocation25_spill] sm:$0xff] %v2109_v55 }
  0x4a   :  { %1394 = vmatpush3.bf16.msra.mxu0 %v1771_v12  ;;  %1663 = vmatprep.subr.bf16.mxu1 %v1828_v39 }
  0x4b   :  { %1395 = vmatprep.subr.bf16.mxu0 %v1772_v13 }
  0x4d   :  { %1664 = vmatpush3.bf16.msra.mxu1 %v1828_v39 }
  0x4e   :  { %1396 = vmatpush3.bf16.msra.mxu0 %v1773_v14  ;;  %1665 = vmatprep.subr.bf16.mxu1 %v1829_v42 }
  0x4f   :  { %1397 = vmatprep.subr.bf16.mxu0 %v1774_v15 }
  0x51   :  { %1666 = vmatpush3.bf16.msra.mxu1 %v1829_v42 }
  0x52   :  { %1398 = vmatpush3.bf16.msra.mxu0 %v1775_v16  ;;  %1667 = vmatprep.subr.bf16.mxu1 %v1830_v43 }
  0x55   :  { %433 = vmatmul.mubr.bf16.vlgmr.msra.gmra.mxu0 %v2019_v17  ;;  %1668 = vmatpush3.bf16.msra.mxu1 %v1830_v43 }
  0x56   :  { %440 = vmatprep.mubr.bf16.mxu0 %v2021_v18  ;;  %1669 = vmatprep.subr.bf16.mxu1 %v1831_v46 }
  0x59   :  { %1670 = vmatpush3.bf16.msra.mxu1 %v1831_v46 }
  0x5d   :  { %441 = vmatmul.mubr.bf16.gmra.mxu0 %v2025_v19 }
  0x5e   :  { %448 = vmatprep.mubr.bf16.mxu0 %v2027_v20 }
  0x65   :  { %449 = vmatmul.mubr.bf16.gmra.mxu0 %v2031_v24 }
  0x66   :  { %456 = vmatprep.mubr.bf16.mxu0 %v2033_v26 }
  0x6d   :  { %457 = vmatmul.mubr.bf16.gmra.mxu0 %v2037_v27 }
  0x6e   :  { %464 = vmatprep.mubr.bf16.mxu0 %v2039_v28 }
  0x75   :  { %465 = vmatmul.mubr.bf16.gmra.mxu0 %v2043_v29 }
  0x76   :  { %472 = vmatprep.mubr.bf16.mxu0 %v2045_v30 }
  0x7d   :  { %473 = vmatmul.mubr.bf16.gmra.mxu0 %v2049_v31 }
  0x7e   :  { %480 = vmatprep.mubr.bf16.mxu0 %v2051_v32 }
  0x85   :  { %481 = vmatmul.mubr.bf16.gmra.mxu0 %v2055_v33 }
  0x86   :  { %488 = vmatprep.mubr.bf16.mxu0 %v2057_v34 }
  0x8d   :  { %489 = vmatmul.mubr.bf16.gmra.mxu0 %v2061_v35 }
  0x8e   :  { %496 = vmatprep.mubr.bf16.mxu0 %v2063_v36 }
  0x95   :  { %497 = vmatmul.mubr.bf16.gmra.mxu0 %v2067_v37 }
  0x96   :  { %504 = vmatprep.mubr.bf16.mxu0 %v2069_v38 }
  0x9d   :  { %505 = vmatmul.mubr.bf16.gmra.mxu0 %v2073_v40 }
  0x9e   :  { %512 = vmatprep.mubr.bf16.mxu0 %v2075_v41 }
  0xa5   :  { %513 = vmatmul.mubr.bf16.gmra.mxu0 %v2079_v44 }
  0xa6   :  { %520 = vmatprep.mubr.bf16.mxu0 %v2081_v45 }
  0xad   :  { %521 = vmatmul.mubr.bf16.gmra.mxu0 %v2085_v47 }
  0xae   :  { %528 = vmatprep.mubr.bf16.mxu0 %v2087_v48 }
  0xb5   :  { %529 = vmatmul.mubr.bf16.gmra.mxu0 %v2091_v49 }
  0xb6   :  { %536 = vmatprep.mubr.bf16.mxu0 %v2093_v50 }
  0xbd   :  { %537 = vmatmul.mubr.bf16.gmra.mxu0 %v2097_v51 }
  0xbe   :  { %544 = vmatprep.mubr.bf16.mxu0 %v2099_v52 }
  0xc5   :  { %545 = vmatmul.mubr.bf16.gmra.mxu0 %v2103_v53 }
  0xc6   :  { %552 = vmatprep.mubr.bf16.mxu0 %v2105_v54 }
  0xcd   :  { %553 = vmatmul.mubr.bf16.gmra.mxu0 %v2109_v55 }
 0x115   :  { %v1399_v56 = vpop.f32.mrf.mxu0 }
 0x117   :  { %v1400_v57 = vpop.f32.mrf.mxu0 }
 0x118   :  { %v1401_v60 = vadd.f32 %v1400_v57, %v1399_v56 }
 0x119   :  { %v1402_v58 = vpop.f32.mrf.mxu0 }
 0x11b   :  { %v1403_v59 = vpop.f32.mrf.mxu0 }
 0x11c   :  { %v1404_v61 = vadd.f32 %v1403_v59, %v1402_v58 }
 0x11d   :  { %v1405_v62 = vpop.f32.mrf.mxu0 }
 0x11e   :  { %v561_v63 = vpack.c.bf16 %v1404_v61, %v1401_v60 }
 0x11f   :  { %v1406_v0 = vpop.f32.mrf.mxu0 }
 0x120   :  { %1671 = vmatprep.mubr.bf16.mxu1 %v561_v63  ;;  %v1407_v3 = vadd.f32 %v1406_v0, %v1405_v62 }
 0x121   :  { %v1408_v1 = vpop.f32.mrf.mxu0 }
 0x123   :  { %v1409_v2 = vpop.f32.mrf.mxu0 }
 0x124   :  { %v1410_v4 = vadd.f32 %v1409_v2, %v1408_v1 }
 0x125   :  { %v1411_v5 = vpop.f32.mrf.mxu0 }
 0x126   :  { %v562_v6 = vpack.c.bf16 %v1410_v4, %v1407_v3 }
 0x127   :  { %v1412_v7 = vpop.f32.mrf.mxu0 }
 0x128   :  { %1672 = vmatmul.mubr.bf16.vlgmr.msra.gmra.mxu1 %v562_v6  ;;  %v1413_v10 = vadd.f32 %v1412_v7, %v1411_v5 }
 0x129   :  { %v1414_v8 = vpop.f32.mrf.mxu0 }
 0x12b   :  { %v1415_v9 = vpop.f32.mrf.mxu0 }
 0x12c   :  { %v1416_v12 = vadd.f32 %v1415_v9, %v1414_v8 }
 0x12d   :  { %v1417_v13 = vpop.f32.mrf.mxu0 }
 0x12e   :  { %v563_v14 = vpack.c.bf16 %v1416_v12, %v1413_v10 }
 0x12f   :  { %v1418_v15 = vpop.f32.mrf.mxu0 }
 0x130   :  { %1675 = vmatprep.mubr.bf16.mxu1 %v563_v14  ;;  %v1419_v22 = vadd.f32 %v1418_v15, %v1417_v13 }
 0x131   :  { %v1420_v16 = vpop.f32.mrf.mxu0 }
 0x133   :  { %v1421_v21 = vpop.f32.mrf.mxu0 }
 0x134   :  { %v1422_v23 = vadd.f32 %v1421_v21, %v1420_v16 }
 0x135   :  { %v1423_v25 = vpop.f32.mrf.mxu0 }
 0x136   :  { %v564_v39 = vpack.c.bf16 %v1422_v23, %v1419_v22 }
 0x137   :  { %v1424_v42 = vpop.f32.mrf.mxu0 }
 0x138   :  { %1676 = vmatmul.mubr.bf16.gmra.mxu1 %v564_v39  ;;  %v1425_v56 = vadd.f32 %v1424_v42, %v1423_v25 }
 0x139   :  { %v1426_v43 = vpop.f32.mrf.mxu0 }
 0x13b   :  { %v1427_v46 = vpop.f32.mrf.mxu0 }
 0x13c   :  { %v1428_v57 = vadd.f32 %v1427_v46, %v1426_v43 }
 0x13d   :  { %v1429_v58 = vpop.f32.mrf.mxu0 }
 0x13e   :  { %v565_v59 = vpack.c.bf16 %v1428_v57, %v1425_v56 }
 0x13f   :  { %v1430_v60 = vpop.f32.mrf.mxu0 }
 0x140   :  { %1679 = vmatprep.mubr.bf16.mxu1 %v565_v59  ;;  %v1431_v63 = vadd.f32 %v1430_v60, %v1429_v58 }
 0x141   :  { %v1432_v61 = vpop.f32.mrf.mxu0 }
 0x143   :  { %v1433_v62 = vpop.f32.mrf.mxu0 }
 0x144   :  { %v1434_v0 = vadd.f32 %v1433_v62, %v1432_v61 }
 0x145   :  { %v1435_v1 = vpop.f32.mrf.mxu0 }
 0x146   :  { %v566_v2 = vpack.c.bf16 %v1434_v0, %v1431_v63 }
 0x147   :  { %v1436_v3 = vpop.f32.mrf.mxu0 }
 0x148   :  { %1680 = vmatmul.mubr.bf16.gmra.mxu1 %v566_v2  ;;  %v1437_v6 = vadd.f32 %v1436_v3, %v1435_v1 }
 0x149   :  { %v1438_v4 = vpop.f32.mrf.mxu0 }
 0x14b   :  { %v1439_v5 = vpop.f32.mrf.mxu0 }
 0x14c   :  { %v1440_v7 = vadd.f32 %v1439_v5, %v1438_v4 }
 0x14d   :  { %v1441_v8 = vpop.f32.mrf.mxu0 }
 0x14e   :  { %v567_v9 = vpack.c.bf16 %v1440_v7, %v1437_v6 }
 0x14f   :  { %v1442_v10 = vpop.f32.mrf.mxu0 }
 0x150   :  { %1683 = vmatprep.mubr.bf16.mxu1 %v567_v9  ;;  %v1443_v14 = vadd.f32 %v1442_v10, %v1441_v8 }
 0x151   :  { %v1444_v12 = vpop.f32.mrf.mxu0 }
 0x153   :  { %v1445_v13 = vpop.f32.mrf.mxu0 }
 0x154   :  { %v1446_v15 = vadd.f32 %v1445_v13, %v1444_v12 }
 0x155   :  { %v1447_v16 = vpop.f32.mrf.mxu0 }
 0x156   :  { %v568_v21 = vpack.c.bf16 %v1446_v15, %v1443_v14 }
 0x157   :  { %v1448_v22 = vpop.f32.mrf.mxu0 }
 0x158   :  { %1684 = vmatmul.mubr.bf16.gmra.mxu1 %v568_v21  ;;  %v1449_v39 = vadd.f32 %v1448_v22, %v1447_v16 }
 0x159   :  { %v1450_v23 = vpop.f32.mrf.mxu0 }
 0x15b   :  { %v1451_v25 = vpop.f32.mrf.mxu0 }
 0x15c   :  { %v1452_v42 = vadd.f32 %v1451_v25, %v1450_v23 }
 0x15d   :  { %v1453_v43 = vpop.f32.mrf.mxu0 }
 0x15e   :  { %v569_v46 = vpack.c.bf16 %v1452_v42, %v1449_v39 }
 0x15f   :  { %v1454_v56 = vpop.f32.mrf.mxu0 }
 0x160   :  { %1687 = vmatprep.mubr.bf16.mxu1 %v569_v46  ;;  %v1455_v59 = vadd.f32 %v1454_v56, %v1453_v43 }
 0x161   :  { %v1456_v57 = vpop.f32.mrf.mxu0 }
 0x163   :  { %v1457_v58 = vpop.f32.mrf.mxu0 }
 0x164   :  { %v1458_v60 = vadd.f32 %v1457_v58, %v1456_v57 }
 0x165   :  { %v1459_v61 = vpop.f32.mrf.mxu0 }
 0x166   :  { %v570_v62 = vpack.c.bf16 %v1458_v60, %v1455_v59 }
 0x167   :  { %v1460_v63 = vpop.f32.mrf.mxu0 }
 0x168   :  { %1688 = vmatmul.mubr.bf16.gmra.mxu1 %v570_v62  ;;  %v1461_v2 = vadd.f32 %v1460_v63, %v1459_v61 }
 0x169   :  { %v1462_v0 = vpop.f32.mrf.mxu0 }
 0x16b   :  { %v1463_v1 = vpop.f32.mrf.mxu0 }
 0x16c   :  { %v1464_v3 = vadd.f32 %v1463_v1, %v1462_v0 }
 0x16d   :  { %v1465_v4 = vpop.f32.mrf.mxu0 }
 0x16e   :  { %v571_v5 = vpack.c.bf16 %v1464_v3, %v1461_v2 }
 0x16f   :  { %v1466_v6 = vpop.f32.mrf.mxu0 }
 0x170   :  { %1691 = vmatprep.mubr.bf16.mxu1 %v571_v5  ;;  %v1467_v9 = vadd.f32 %v1466_v6, %v1465_v4 }
 0x171   :  { %v1468_v7 = vpop.f32.mrf.mxu0 }
 0x173   :  { %v1469_v8 = vpop.f32.mrf.mxu0 }
 0x174   :  { %v1470_v10 = vadd.f32 %v1469_v8, %v1468_v7 }
 0x175   :  { %v1471_v12 = vpop.f32.mrf.mxu0 }
 0x176   :  { %v572_v13 = vpack.c.bf16 %v1470_v10, %v1467_v9  ;;  %v2116_v9 = vld [vmem:[%s2251_s3] ss:$0 sm:$0xff] }
 0x177   :  { %v1472_v14 = vpop.f32.mrf.mxu0 }
 0x178   :  { %1692 = vmatmul.mubr.bf16.gmra.mxu1 %v572_v13  ;;  %v1473_v21 = vadd.f32 %v1472_v14, %v1471_v12 }
 0x179   :  { %v1474_v15 = vpop.f32.mrf.mxu0 }
 0x17b   :  { %v1475_v16 = vpop.f32.mrf.mxu0 }
 0x17c   :  { %v1476_v22 = vadd.f32 %v1475_v16, %v1474_v15 }
 0x17d   :  { %v1477_v23 = vpop.f32.mrf.mxu0 }
 0x17e   :  { %v573_v25 = vpack.c.bf16 %v1476_v22, %v1473_v21 }
 0x17f   :  { %v1478_v39 = vpop.f32.mrf.mxu0 }
 0x180   :  { %1695 = vmatprep.mubr.bf16.mxu1 %v573_v25  ;;  %v1479_v46 = vadd.f32 %v1478_v39, %v1477_v23 }
 0x181   :  { %v1480_v42 = vpop.f32.mrf.mxu0 }
 0x183   :  { %v1481_v43 = vpop.f32.mrf.mxu0 }
 0x184   :  { %v1482_v56 = vadd.f32 %v1481_v43, %v1480_v42 }
 0x185   :  { %v1483_v57 = vpop.f32.mrf.mxu0 }
 0x186   :  { %v574_v58 = vpack.c.bf16 %v1482_v56, %v1479_v46 }
 0x187   :  { %v1484_v59 = vpop.f32.mrf.mxu0 }
 0x188   :  { %1696 = vmatmul.mubr.bf16.gmra.mxu1 %v574_v58  ;;  %v1485_v62 = vadd.f32 %v1484_v59, %v1483_v57 }
 0x189   :  { %v1486_v60 = vpop.f32.mrf.mxu0 }
 0x18b   :  { %v1487_v61 = vpop.f32.mrf.mxu0 }
 0x18c   :  { %v1488_v63 = vadd.f32 %v1487_v61, %v1486_v60 }
 0x18d   :  { %v1489_v0 = vpop.f32.mrf.mxu0 }
 0x18e   :  { %v575_v1 = vpack.c.bf16 %v1488_v63, %v1485_v62 }
 0x18f   :  { %v1490_v2 = vpop.f32.mrf.mxu0 }
 0x190   :  { %1699 = vmatprep.mubr.bf16.mxu1 %v575_v1  ;;  %v1491_v5 = vadd.f32 %v1490_v2, %v1489_v0 }
 0x191   :  { %v1492_v3 = vpop.f32.mrf.mxu0 }
 0x193   :  { %v1493_v4 = vpop.f32.mrf.mxu0 }
 0x194   :  { %v1494_v6 = vadd.f32 %v1493_v4, %v1492_v3 }
 0x196   :  { %v576_v7 = vpack.c.bf16 %v1494_v6, %v1491_v5 }
 0x198   :  { %1700 = vmatmul.mubr.bf16.gmra.mxu1 %v576_v7 }
 0x199   :  { %889 = vmatprep.mubr.bf16.mxu1 %v2016_v11 }
 0x1e8   :  { %v1673_v8 = vpop.f32.mrf.mxu1 }
 0x1e9   :  { %v691_v12 = vadd.f32 %v1673_v8, %v2116_v9 }
 0x1ea   :  { %v682_v10 = vpop.f32.mrf.mxu1 }
 0x1eb   :  { %v683_v14 = vadd.f32 %v2116_v9, %v682_v10  ;;  %v811_v21 = vmax.f32 %v691_v12, 0.0 }
 0x1ec   :  { %v1674_v13 = vpop.f32.mrf.mxu1 }
 0x1ed   :  { %v694_v15 = vadd.f32 %v1674_v13, %v2116_v9  ;;  %v809_v11 = vmax.f32 %v683_v14, 0.0 }
 0x1ee   :  { %v685_v16 = vpop.f32.mrf.mxu1 }
 0x1ef   :  { %v812_v22 = vmax.f32 %v694_v15, 0.0  ;;  %v686_v23 = vadd.f32 %v2116_v9, %v685_v16 }
 0x1f1   :  { %v2122_v25 = vpack.c.bf16 %v812_v22, %v811_v21  ;;  %v810_v39 = vmax.f32 %v686_v23, 0.0 }
 0x1f3   :  { %v2124_v42 = vpack.c.bf16 %v810_v39, %v809_v11 }
 0x1f8   :  { %v1677_v43 = vpop.f32.mrf.mxu1 }
 0x1f9   :  { %v707_v56 = vadd.f32 %v1677_v43, %v2116_v9 }
 0x1fa   :  { %v698_v46 = vpop.f32.mrf.mxu1 }
 0x1fb   :  { %v699_v58 = vadd.f32 %v2116_v9, %v698_v46  ;;  %v815_v61 = vmax.f32 %v707_v56, 0.0 }
 0x1fc   :  { %v1678_v57 = vpop.f32.mrf.mxu1 }
 0x1fd   :  { %v710_v59 = vadd.f32 %v1678_v57, %v2116_v9  ;;  %v813_v0 = vmax.f32 %v699_v58, 0.0 }
 0x1fe   :  { %v701_v60 = vpop.f32.mrf.mxu1 }
 0x1ff   :  { %v816_v62 = vmax.f32 %v710_v59, 0.0  ;;  %v702_v63 = vadd.f32 %v2116_v9, %v701_v60 }
 0x201   :  { %v2130_v1 = vpack.c.bf16 %v816_v62, %v815_v61  ;;  %v814_v2 = vmax.f32 %v702_v63, 0.0 }
 0x203   :  { %v2132_v3 = vpack.c.bf16 %v814_v2, %v813_v0 }
 0x208   :  { %v1681_v4 = vpop.f32.mrf.mxu1 }
 0x20a   :  { %v714_v5 = vpop.f32.mrf.mxu1 }
 0x20c   :  { %v1682_v6 = vpop.f32.mrf.mxu1 }
 0x20e   :  { %v717_v7 = vpop.f32.mrf.mxu1 }
 0x218   :  { %v1685_v8 = vpop.f32.mrf.mxu1 }
 0x219   :  { %v739_v62 = vadd.f32 %v1685_v8, %v2116_v9 }
 0x21a   :  { %v730_v10 = vpop.f32.mrf.mxu1 }
 0x21b   :  { %v823_v49 = vmax.f32 %v739_v62, 0.0 }
 0x21c   :  { %v1686_v12 = vpop.f32.mrf.mxu1 }
 0x21d   :  { %v742_v59 = vadd.f32 %v1686_v12, %v2116_v9 }
 0x21e   :  { %v733_v13 = vpop.f32.mrf.mxu1 }
 0x21f   :  { %v824_v55 = vmax.f32 %v742_v59, 0.0  ;;  %v734_v54 = vadd.f32 %v2116_v9, %v733_v13 }
 0x221   :  { %v848_v59 = vpack.c.bf16 %v824_v55, %v823_v49  ;;  %v822_v45 = vmax.f32 %v734_v54, 0.0 }
 0x228   :  { %v2134_v14 = vpop.f32.mrf.mxu1 }
 0x22a   :  { %v2136_v15 = vpop.f32.mrf.mxu1 }
 0x22c   :  { %v2138_v16 = vpop.f32.mrf.mxu1 }
 0x22e   :  { %v2140_v21 = vpop.f32.mrf.mxu1 }
 0x238   :  { %v1693_v22 = vpop.f32.mrf.mxu1 }
 0x23a   :  { %v762_v23 = vpop.f32.mrf.mxu1 }
 0x23c   :  { %v1694_v11 = vpop.f32.mrf.mxu1 }
 0x23d   :  { %v774_v49 = vadd.f32 %v1694_v11, %v2116_v9  ;;  %v763_v11 = vadd.f32 %v2116_v9, %v762_v23 }
 0x23e   :  { %v765_v39 = vpop.f32.mrf.mxu1 }
 0x248   :  { %v1697_v43 = vpop.f32.mrf.mxu1 }
 0x249   :  { %v787_v8 = vadd.f32 %v1697_v43, %v2116_v9 }
 0x24a   :  { %v778_v46 = vpop.f32.mrf.mxu1 }
 0x24b   :  { %v835_v62 = vmax.f32 %v787_v8, 0.0  ;;  %v829_v8 = vmax.f32 %v763_v11, 0.0 }
 0x24c   :  { %v1698_v56 = vpop.f32.mrf.mxu1 }
 0x24d   :  { %v790_v52 = vadd.f32 %v1698_v56, %v2116_v9 }
 0x24e   :  { %v781_v57 = vpop.f32.mrf.mxu1 }
 0x24f   :  { %v836_v13 = vmax.f32 %v790_v52, 0.0  ;;  %v782_v44 = vadd.f32 %v2116_v9, %v781_v57 }
 0x251   :  { %v854_v54 = vpack.c.bf16 %v836_v13, %v835_v62  ;;  %v834_v52 = vmax.f32 %v782_v44, 0.0 }
 0x258   :  { %v1701_v58 = vpop.f32.mrf.mxu1 }
 0x259   :  { %v803_v61 = vadd.f32 %v1701_v58, %v2116_v9  ;;  %v731_v58 = vadd.f32 %v2116_v9, %v730_v10  ;;  %v779_v10 = vadd.f32 %v2116_v9, %v778_v46  ;;  %v832_v46 = vmax.f32 %v774_v49, 0.0 }
 0x25a   :  { %v794_v60 = vpop.f32.mrf.mxu1 }
 0x25b   :  { %v795_v0 = vadd.f32 %v2116_v9, %v794_v60  ;;  %v839_v51 = vmax.f32 %v803_v61, 0.0  ;;  %v723_v61 = vadd.f32 %v1681_v4, %v2116_v9  ;;  %v833_v4 = vmax.f32 %v779_v10, 0.0 }
 0x25c   :  { %v1702_v63 = vpop.f32.mrf.mxu1 }
 0x25d   :  { %v806_v2 = vadd.f32 %v1702_v63, %v2116_v9  ;;  %v837_v48 = vmax.f32 %v795_v0, 0.0  ;;  %v726_v63 = vadd.f32 %v1682_v6, %v2116_v9  ;;  %v819_v55 = vmax.f32 %v723_v61, 0.0  ;;  %v1832_v61 = vld [vmem:[#allocation8 + $0x38] sm:$0xff]  }
 0x25e   :  { %v797_v53 = vpop.f32.mrf.mxu1  ;;  %v766_v0 = vadd.f32 %v2116_v9, %v765_v39  ;;  %1703 = vmatprep.subr.bf16.mxu0 %v1832_v61 }
 0x25f   :  { %v840_v50 = vmax.f32 %v806_v2, 0.0  ;;  %v798_v12 = vadd.f32 %v2116_v9, %v797_v53  ;;  %v821_v53 = vmax.f32 %v731_v58, 0.0  ;;  %v820_v43 = vmax.f32 %v726_v63, 0.0  ;;  %1704 = vmatpush3.bf16.msra.mxu0 %v1832_v61 }
 0x260   :  { %v853_v2 = vpack.c.bf16 %v834_v52, %v833_v4  ;;  %v755_v58 = vadd.f32 %v2134_v14, %v2116_v9 }
 0x261   :  { %v856_v47 = vpack.c.bf16 %v840_v50, %v839_v51  ;;  %v838_v60 = vmax.f32 %v798_v12, 0.0  ;;  %v718_v50 = vadd.f32 %v2116_v9, %v717_v7  ;;  %v847_v51 = vpack.c.bf16 %v822_v45, %v821_v53  ;;  %v1833_v53 = vld [vmem:[#allocation8 + $0x30] sm:$0xff]  }
 0x262   :  { %v846_v6 = vpack.c.bf16 %v820_v43, %v819_v55  ;;  %v827_v23 = vmax.f32 %v755_v58, 0.0  ;;  %1705 = vmatprep.subr.bf16.mxu0 %v1833_v53 }
 0x263   :  { %v855_v56 = vpack.c.bf16 %v838_v60, %v837_v48  ;;  %1519 = vmatprep.subr.bf16.mxu1 %v856_v47  ;;  %v715_v48 = vadd.f32 %v2116_v9, %v714_v5  ;;  %v771_v47 = vadd.f32 %v1693_v22, %v2116_v9  ;;  %v818_v57 = vmax.f32 %v718_v50, 0.0  ;;  %1706 = vmatpush3.bf16.msra.mxu0 %v1833_v53 }
 0x264   :  { %1520 = vmatpush3.bf16.msra.mxu1 %v848_v59  ;;  %v758_v5 = vadd.f32 %v2138_v16, %v2116_v9  ;;  %v830_v22 = vmax.f32 %v766_v0, 0.0  ;;  %v750_v60 = vadd.f32 %v2116_v9, %v2140_v21  ;;  %v747_v59 = vadd.f32 %v2116_v9, %v2136_v15  ;;  %v1835_v9 = vld [vmem:[#allocation8 + $0x20] sm:$0xff]  }
 0x265   :  { %1521 = vmatprep.subr.bf16.mxu1 %v855_v56  ;;  %v817_v7 = vmax.f32 %v715_v48, 0.0  ;;  %v831_v45 = vmax.f32 %v771_v47, 0.0 }
 0x266   :  { %v828_v39 = vmax.f32 %v758_v5, 0.0  ;;  %v851_v63 = vpack.c.bf16 %v830_v22, %v829_v8  ;;  %v826_v13 = vmax.f32 %v750_v60, 0.0  ;;  %v825_v56 = vmax.f32 %v747_v59, 0.0 }
 0x267   :  { %v845_v44 = vpack.c.bf16 %v818_v57, %v817_v7  ;;  %v852_v12 = vpack.c.bf16 %v832_v46, %v831_v45 }
 0x268   :  { %1522 = vmatpush3.bf16.msra.mxu1 %v847_v51  ;;  %v850_v16 = vpack.c.bf16 %v828_v39, %v827_v23  ;;  %v849_v14 = vpack.c.bf16 %v826_v13, %v825_v56 }
 0x269   :  { %1523 = vmatprep.subr.bf16.mxu1 %v854_v54 }
 0x26c   :  { %1524 = vmatpush3.bf16.msra.mxu1 %v846_v6 }
 0x26d   :  { %1525 = vmatprep.subr.bf16.mxu1 %v853_v2 }
 0x270   :  { %1526 = vmatpush3.bf16.msra.mxu1 %v845_v44 }
 0x271   :  { %1527 = vmatprep.subr.bf16.mxu1 %v852_v12 }
 0x274   :  { %1528 = vmatpush3.bf16.msra.mxu1 %v2130_v1  ;;  %v1834_v1 = vld [vmem:[#allocation8 + $0x28] sm:$0xff]  }
 0x275   :  { %1529 = vmatprep.subr.bf16.mxu1 %v851_v63  ;;  %1707 = vmatprep.subr.bf16.mxu0 %v1834_v1 }
 0x276   :  { %1708 = vmatpush3.bf16.msra.mxu0 %v1834_v1 }
 0x277   :  { %1709 = vmatprep.subr.bf16.mxu0 %v1835_v9 }
 0x278   :  { %1530 = vmatpush3.bf16.msra.mxu1 %v2132_v3 }
 0x279   :  { %1531 = vmatprep.subr.bf16.mxu1 %v850_v16 }
 0x27a   :  { %1710 = vmatpush3.bf16.msra.mxu0 %v1835_v9 }
 0x27c   :  { %1532 = vmatpush3.bf16.msra.mxu1 %v2122_v25 }
 0x27d   :  { %1533 = vmatprep.subr.bf16.mxu1 %v849_v14 }
 0x280   :  { %1534 = vmatpush3.bf16.msra.mxu1 %v2124_v42 }
 0x283   :  { %890 = vmatmul.mubr.bf16.vlgmr.msra.gmra.mxu1 %v2019_v17  ;;  %v1836_v17 = vld [vmem:[#allocation8 + $0x18] sm:$0xff]  }
 0x284   :  { %897 = vmatprep.mubr.bf16.mxu1 %v2021_v18  ;;  %1711 = vmatprep.subr.bf16.mxu0 %v1836_v17  ;;  %v1837_v18 = vld [vmem:[#allocation8 + $0x10] sm:$0xff]  }
 0x285   :  { %1712 = vmatpush3.bf16.msra.mxu0 %v1836_v17 }
 0x286   :  { %1713 = vmatprep.subr.bf16.mxu0 %v1837_v18 }
 0x289   :  { %1714 = vmatpush3.bf16.msra.mxu0 %v1837_v18 }
 0x28b   :  { %898 = vmatmul.mubr.bf16.gmra.mxu1 %v2025_v19  ;;  %v1838_v19 = vld [vmem:[#allocation8 + $0x8] sm:$0xff]  }
 0x28c   :  { %905 = vmatprep.mubr.bf16.mxu1 %v2027_v20  ;;  %1715 = vmatprep.subr.bf16.mxu0 %v1838_v19  ;;  %v1839_v20 = vld [vmem:[#allocation8] sm:$0xff]  }
 0x28d   :  { %1716 = vmatpush3.bf16.msra.mxu0 %v1838_v19 }
 0x28e   :  { %1717 = vmatprep.subr.bf16.mxu0 %v1839_v20 }
 0x291   :  { %1718 = vmatpush3.bf16.msra.mxu0 %v1839_v20 }
 0x293   :  { %906 = vmatmul.mubr.bf16.gmra.mxu1 %v2031_v24  ;;  %v2277_v24 = vld [vmem:[#allocation15_spill] sm:$0xff] }
 0x294   :  { %913 = vmatprep.mubr.bf16.mxu1 %v2033_v26  ;;  %v2278_v26 = vld [vmem:[#allocation16_spill] sm:$0xff] }
 0x29b   :  { %914 = vmatmul.mubr.bf16.gmra.mxu1 %v2037_v27  ;;  %v2279_v27 = vld [vmem:[#allocation17_spill] sm:$0xff] }
 0x29c   :  { %921 = vmatprep.mubr.bf16.mxu1 %v2039_v28  ;;  %v2280_v28 = vld [vmem:[#allocation18_spill] sm:$0xff] }
 0x2a3   :  { %922 = vmatmul.mubr.bf16.gmra.mxu1 %v2043_v29  ;;  %v2281_v29 = vld [vmem:[#allocation19_spill] sm:$0xff] }
 0x2a4   :  { %929 = vmatprep.mubr.bf16.mxu1 %v2045_v30  ;;  %v2282_v30 = vld [vmem:[#allocation20_spill] sm:$0xff] }
 0x2ab   :  { %930 = vmatmul.mubr.bf16.gmra.mxu1 %v2049_v31  ;;  %v2283_v31 = vld [vmem:[#allocation21_spill] sm:$0xff] }
 0x2ac   :  { %937 = vmatprep.mubr.bf16.mxu1 %v2051_v32  ;;  %v2284_v32 = vld [vmem:[#allocation22_spill] sm:$0xff] }
 0x2b3   :  { %938 = vmatmul.mubr.bf16.gmra.mxu1 %v2055_v33  ;;  %v2285_v33 = vld [vmem:[#allocation23_spill] sm:$0xff] }
 0x2b4   :  { %945 = vmatprep.mubr.bf16.mxu1 %v2057_v34  ;;  %v2286_v34 = vld [vmem:[#allocation24_spill] sm:$0xff] }
 0x2bb   :  { %946 = vmatmul.mubr.bf16.gmra.mxu1 %v2061_v35  ;;  %v2287_v35 = vld [vmem:[#allocation25_spill] sm:$0xff] }
 0x2bc   :  { %953 = vmatprep.mubr.bf16.mxu1 %v2063_v36 }
 0x2c3   :  { %954 = vmatmul.mubr.bf16.gmra.mxu1 %v2067_v37 }
 0x2c4   :  { %961 = vmatprep.mubr.bf16.mxu1 %v2069_v38 }
 0x2cb   :  { %962 = vmatmul.mubr.bf16.gmra.mxu1 %v2073_v40 }
 0x2cc   :  { %969 = vmatprep.mubr.bf16.mxu1 %v2075_v41 }
 0x2d3   :  { %970 = vmatmul.mubr.bf16.gmra.mxu1 %v2277_v24 }
 0x2d4   :  { %977 = vmatprep.mubr.bf16.mxu1 %v2278_v26 }
 0x2db   :  { %978 = vmatmul.mubr.bf16.gmra.mxu1 %v2279_v27 }
 0x2dc   :  { %985 = vmatprep.mubr.bf16.mxu1 %v2280_v28 }
 0x2e3   :  { %986 = vmatmul.mubr.bf16.gmra.mxu1 %v2281_v29 }
 0x2e4   :  { %993 = vmatprep.mubr.bf16.mxu1 %v2282_v30 }
 0x2eb   :  { %994 = vmatmul.mubr.bf16.gmra.mxu1 %v2283_v31 }
 0x2ec   :  { %1001 = vmatprep.mubr.bf16.mxu1 %v2284_v32 }
 0x2f3   :  { %1002 = vmatmul.mubr.bf16.gmra.mxu1 %v2285_v33 }
 0x2f4   :  { %1009 = vmatprep.mubr.bf16.mxu1 %v2286_v34 }
 0x2fb   :  { %1010 = vmatmul.mubr.bf16.gmra.mxu1 %v2287_v35 }
 0x343   :  { %v1535_v36 = vpop.f32.mrf.mxu1 }
 0x345   :  { %v1536_v37 = vpop.f32.mrf.mxu1 }
 0x346   :  { %v1537_v41 = vadd.f32 %v1536_v37, %v1535_v36 }
 0x347   :  { %v1538_v38 = vpop.f32.mrf.mxu1 }
 0x349   :  { %v1539_v40 = vpop.f32.mrf.mxu1 }
 0x34a   :  { %v1540_v25 = vadd.f32 %v1539_v40, %v1538_v38 }
 0x34b   :  { %v1541_v42 = vpop.f32.mrf.mxu1 }
 0x34c   :  { %v1018_v3 = vpack.c.bf16 %v1540_v25, %v1537_v41 }
 0x34d   :  { %v1542_v15 = vpop.f32.mrf.mxu1 }
 0x34e   :  { %1719 = vmatprep.mubr.bf16.mxu0 %v1018_v3  ;;  %v1543_v10 = vadd.f32 %v1542_v15, %v1541_v42 }
 0x34f   :  { %v1544_v21 = vpop.f32.mrf.mxu1 }
 0x351   :  { %v1545_v62 = vpop.f32.mrf.mxu1 }
 0x352   :  { %v1546_v43 = vadd.f32 %v1545_v62, %v1544_v21 }
 0x353   :  { %v1547_v50 = vpop.f32.mrf.mxu1 }
 0x354   :  { %v1019_v51 = vpack.c.bf16 %v1546_v43, %v1543_v10 }
 0x355   :  { %v1548_v49 = vpop.f32.mrf.mxu1 }
 0x356   :  { %1720 = vmatmul.mubr.bf16.vlgmr.msra.gmra.mxu0 %v1019_v51  ;;  %v1549_v55 = vadd.f32 %v1548_v49, %v1547_v50 }
 0x357   :  { %v1550_v54 = vpop.f32.mrf.mxu1 }
 0x359   :  { %v1551_v52 = vpop.f32.mrf.mxu1 }
 0x35a   :  { %v1552_v48 = vadd.f32 %v1551_v52, %v1550_v54 }
 0x35b   :  { %v1553_v47 = vpop.f32.mrf.mxu1 }
 0x35c   :  { %v1020_v4 = vpack.c.bf16 %v1552_v48, %v1549_v55 }
 0x35d   :  { %v1554_v6 = vpop.f32.mrf.mxu1 }
 0x35e   :  { %1723 = vmatprep.mubr.bf16.mxu0 %v1020_v4  ;;  %v1555_v0 = vadd.f32 %v1554_v6, %v1553_v47 }
 0x35f   :  { %v1556_v57 = vpop.f32.mrf.mxu1 }
 0x361   :  { %v1557_v46 = vpop.f32.mrf.mxu1 }
 0x362   :  { %v1558_v2 = vadd.f32 %v1557_v46, %v1556_v57 }
 0x363   :  { %v1559_v7 = vpop.f32.mrf.mxu1 }
 0x364   :  { %v1021_v45 = vpack.c.bf16 %v1558_v2, %v1555_v0 }
 0x365   :  { %v1560_v11 = vpop.f32.mrf.mxu1 }
 0x366   :  { %1724 = vmatmul.mubr.bf16.gmra.mxu0 %v1021_v45  ;;  %v1561_v12 = vadd.f32 %v1560_v11, %v1559_v7 }
 0x367   :  { %v1562_v44 = vpop.f32.mrf.mxu1 }
 0x369   :  { %v1563_v5 = vpop.f32.mrf.mxu1 }
 0x36a   :  { %v1564_v22 = vadd.f32 %v1563_v5, %v1562_v44 }
 0x36b   :  { %v1565_v58 = vpop.f32.mrf.mxu1 }
 0x36c   :  { %v1022_v8 = vpack.c.bf16 %v1564_v22, %v1561_v12 }
 0x36d   :  { %v1566_v39 = vpop.f32.mrf.mxu1 }
 0x36e   :  { %1727 = vmatprep.mubr.bf16.mxu0 %v1022_v8  ;;  %v1567_v23 = vadd.f32 %v1566_v39, %v1565_v58 }
 0x36f   :  { %v1568_v60 = vpop.f32.mrf.mxu1 }
 0x371   :  { %v1569_v63 = vpop.f32.mrf.mxu1 }
 0x372   :  { %v1570_v59 = vadd.f32 %v1569_v63, %v1568_v60 }
 0x373   :  { %v1571_v16 = vpop.f32.mrf.mxu1 }
 0x374   :  { %v1023_v13 = vpack.c.bf16 %v1570_v59, %v1567_v23 }
 0x375   :  { %v1572_v56 = vpop.f32.mrf.mxu1 }
 0x376   :  { %1728 = vmatmul.mubr.bf16.gmra.mxu0 %v1023_v13  ;;  %v1573_v53 = vadd.f32 %v1572_v56, %v1571_v16 }
 0x377   :  { %v1574_v14 = vpop.f32.mrf.mxu1 }
 0x379   :  { %v1575_v61 = vpop.f32.mrf.mxu1 }
 0x37a   :  { %v1576_v1 = vadd.f32 %v1575_v61, %v1574_v14 }
 0x37b   :  { %v1577_v9 = vpop.f32.mrf.mxu1 }
 0x37c   :  { %v1024_v17 = vpack.c.bf16 %v1576_v1, %v1573_v53 }
 0x37d   :  { %v1578_v18 = vpop.f32.mrf.mxu1 }
 0x37e   :  { %1731 = vmatprep.mubr.bf16.mxu0 %v1024_v17  ;;  %v1579_v24 = vadd.f32 %v1578_v18, %v1577_v9  ;;  %v2208_v9 = vld [vmem:[%s2253_s5] ss:$0 sm:$0xff]  ;;  %s1956_s5 = smov [#allocation10]  }
 0x37f   :  { %v1580_v19 = vpop.f32.mrf.mxu1  ;;  %s1303_s20 = sshll.u32 %s1956_s5, 4  ;;  %s1304_s20 = int_to_ptr.vmem [resolvable:$true] %s1303_s20 }
 0x380   :  { %s1920_s21 = scalar_lea.vmem %s1304_s20, 4096  ;;  %p1925_p7 = scmp.lt.s32.totalorder %s1304_s20, %s1304_s20 }
 0x381   :  { %v1581_v20 = vpop.f32.mrf.mxu1  ;;  %p1921_p6 = scmp.ne.s32.totalorder %s1304_s20, %s1920_s21  ;;  %p1926_p8 = scmp.lt.s32.totalorder %s1920_s21, %s1920_s21 }
 0x382   :  { %v1582_v26 = vadd.f32 %v1581_v20, %v1580_v19 }
 0x383   :  { %v1583_v27 = vpop.f32.mrf.mxu1  ;;  %p1927_p9 = por %p1926_p8, %p1925_p7 }
 0x384   :  { %v1025_v28 = vpack.c.bf16 %v1582_v26, %v1579_v24 }
 0x385   :  { %v1584_v29 = vpop.f32.mrf.mxu1  ;;  %p1928_p10 = pnand %p1927_p9, %p1921_p6 }
 0x386   :  { %1732 = vmatmul.mubr.bf16.gmra.mxu0 %v1025_v28  ;;  %v1585_v32 = vadd.f32 %v1584_v29, %v1583_v27 }
 0x387   :  { %v1586_v30 = vpop.f32.mrf.mxu1 }
 0x389   :  { %v1587_v31 = vpop.f32.mrf.mxu1 }
 0x38a   :  { %v1588_v33 = vadd.f32 %v1587_v31, %v1586_v30 }
 0x38b   :  { %v1589_v34 = vpop.f32.mrf.mxu1 }
 0x38c   :  { %v1026_v35 = vpack.c.bf16 %v1588_v33, %v1585_v32 }
 0x38d   :  { %v1590_v36 = vpop.f32.mrf.mxu1 }
 0x38e   :  { %1735 = vmatprep.mubr.bf16.mxu0 %v1026_v35  ;;  %v1591_v40 = vadd.f32 %v1590_v36, %v1589_v34 }
 0x38f   :  { %v1592_v37 = vpop.f32.mrf.mxu1 }
 0x391   :  { %v1593_v38 = vpop.f32.mrf.mxu1 }
 0x392   :  { %v1594_v41 = vadd.f32 %v1593_v38, %v1592_v37 }
 0x393   :  { %v1595_v25 = vpop.f32.mrf.mxu1 }
 0x394   :  { %v1027_v42 = vpack.c.bf16 %v1594_v41, %v1591_v40 }
 0x395   :  { %v1596_v3 = vpop.f32.mrf.mxu1 }
 0x396   :  { %1736 = vmatmul.mubr.bf16.gmra.mxu0 %v1027_v42  ;;  %v1597_v62 = vadd.f32 %v1596_v3, %v1595_v25 }
 0x397   :  { %v1598_v15 = vpop.f32.mrf.mxu1 }
 0x399   :  { %v1599_v21 = vpop.f32.mrf.mxu1 }
 0x39a   :  { %v1600_v10 = vadd.f32 %v1599_v21, %v1598_v15 }
 0x39b   :  { %v1601_v43 = vpop.f32.mrf.mxu1 }
 0x39c   :  { %v1028_v50 = vpack.c.bf16 %v1600_v10, %v1597_v62 }
 0x39d   :  { %v1602_v51 = vpop.f32.mrf.mxu1 }
 0x39e   :  { %1739 = vmatprep.mubr.bf16.mxu0 %v1028_v50  ;;  %v1603_v52 = vadd.f32 %v1602_v51, %v1601_v43 }
 0x39f   :  { %v1604_v49 = vpop.f32.mrf.mxu1 }
 0x3a1   :  { %v1605_v54 = vpop.f32.mrf.mxu1 }
 0x3a2   :  { %v1606_v55 = vadd.f32 %v1605_v54, %v1604_v49 }
 0x3a3   :  { %v1607_v48 = vpop.f32.mrf.mxu1 }
 0x3a4   :  { %v1029_v47 = vpack.c.bf16 %v1606_v55, %v1603_v52 }
 0x3a5   :  { %v1608_v4 = vpop.f32.mrf.mxu1 }
 0x3a6   :  { %1740 = vmatmul.mubr.bf16.gmra.mxu0 %v1029_v47  ;;  %v1609_v46 = vadd.f32 %v1608_v4, %v1607_v48 }
 0x3a7   :  { %v1610_v6 = vpop.f32.mrf.mxu1 }
 0x3a9   :  { %v1611_v57 = vpop.f32.mrf.mxu1 }
 0x3aa   :  { %v1612_v0 = vadd.f32 %v1611_v57, %v1610_v6 }
 0x3ab   :  { %v1613_v2 = vpop.f32.mrf.mxu1 }
 0x3ac   :  { %v1030_v7 = vpack.c.bf16 %v1612_v0, %v1609_v46 }
 0x3ad   :  { %v1614_v45 = vpop.f32.mrf.mxu1 }
 0x3ae   :  { %1743 = vmatprep.mubr.bf16.mxu0 %v1030_v7  ;;  %v1615_v5 = vadd.f32 %v1614_v45, %v1613_v2 }
 0x3af   :  { %v1616_v11 = vpop.f32.mrf.mxu1 }
 0x3b1   :  { %v1617_v44 = vpop.f32.mrf.mxu1 }
 0x3b2   :  { %v1618_v12 = vadd.f32 %v1617_v44, %v1616_v11 }
 0x3b3   :  { %v1619_v22 = vpop.f32.mrf.mxu1 }
 0x3b4   :  { %v1031_v58 = vpack.c.bf16 %v1618_v12, %v1615_v5 }
 0x3b5   :  { %v1620_v8 = vpop.f32.mrf.mxu1 }
 0x3b6   :  { %1744 = vmatmul.mubr.bf16.gmra.mxu0 %v1031_v58  ;;  %v1621_v63 = vadd.f32 %v1620_v8, %v1619_v22 }
 0x3b7   :  { %v1622_v39 = vpop.f32.mrf.mxu1 }
 0x3b9   :  { %v1623_v60 = vpop.f32.mrf.mxu1 }
 0x3ba   :  { %v1624_v23 = vadd.f32 %v1623_v60, %v1622_v39 }
 0x3bb   :  { %v1625_v59 = vpop.f32.mrf.mxu1 }
 0x3bc   :  { %v1032_v16 = vpack.c.bf16 %v1624_v23, %v1621_v63 }
 0x3bd   :  { %v1626_v13 = vpop.f32.mrf.mxu1 }
 0x3be   :  { %1747 = vmatprep.mubr.bf16.mxu0 %v1032_v16  ;;  %v1627_v61 = vadd.f32 %v1626_v13, %v1625_v59 }
 0x3bf   :  { %v1628_v56 = vpop.f32.mrf.mxu1 }
 0x3c1   :  { %v1629_v14 = vpop.f32.mrf.mxu1 }
 0x3c2   :  { %v1630_v53 = vadd.f32 %v1629_v14, %v1628_v56 }
 0x3c4   :  { %v1033_v1 = vpack.c.bf16 %v1630_v53, %v1627_v61 }
 0x3c6   :  { %1748 = vmatmul.mubr.bf16.gmra.mxu0 %v1033_v1 }
 0x416   :  { %v1721_v17 = vpop.f32.mrf.mxu0 }
 0x417   :  { %v1148_v18 = vadd.f32 %v1721_v17, %v2208_v9 }
 0x418   :  { %v1139_v19 = vpop.f32.mrf.mxu0 }
 0x419   :  { %1268 = vst [vmem:[#allocation10 + $0x10] sm:$0xff] %v1148_v18  ;;  %v1140_v20 = vadd.f32 %v2208_v9, %v1139_v19 }
 0x41a   :  { %v1722_v24 = vpop.f32.mrf.mxu0 }
 0x41b   :  { %1266 = vst [vmem:[#allocation10] sm:$0xff] %v1140_v20  ;;  %v1151_v26 = vadd.f32 %v1722_v24, %v2208_v9 }
 0x41c   :  { %v1142_v27 = vpop.f32.mrf.mxu0 }
 0x41d   :  { %1269 = vst [vmem:[#allocation10 + $0x18] sm:$0xff] %v1151_v26  ;;  %v1143_v28 = vadd.f32 %v2208_v9, %v1142_v27 }
 0x41f   :  { %1267 = vst [vmem:[#allocation10 + $0x8] sm:$0xff] %v1143_v28 }
 0x426   :  { %v1725_v29 = vpop.f32.mrf.mxu0 }
 0x427   :  { %v1164_v30 = vadd.f32 %v1725_v29, %v2208_v9 }
 0x428   :  { %v1155_v31 = vpop.f32.mrf.mxu0 }
 0x429   :  { %1272 = vst [vmem:[#allocation10 + $0x30] sm:$0xff] %v1164_v30  ;;  %v1156_v32 = vadd.f32 %v2208_v9, %v1155_v31 }
 0x42a   :  { %v1726_v33 = vpop.f32.mrf.mxu0 }
 0x42b   :  { %1270 = vst [vmem:[#allocation10 + $0x20] sm:$0xff] %v1156_v32  ;;  %v1167_v34 = vadd.f32 %v1726_v33, %v2208_v9 }
 0x42c   :  { %v1158_v35 = vpop.f32.mrf.mxu0 }
 0x42d   :  { %1273 = vst [vmem:[#allocation10 + $0x38] sm:$0xff] %v1167_v34  ;;  %v1159_v36 = vadd.f32 %v2208_v9, %v1158_v35 }
 0x42f   :  { %1271 = vst [vmem:[#allocation10 + $0x28] sm:$0xff] %v1159_v36 }
 0x436   :  { %v1729_v37 = vpop.f32.mrf.mxu0 }
 0x437   :  { %v1180_v38 = vadd.f32 %v1729_v37, %v2208_v9 }
 0x438   :  { %v1171_v40 = vpop.f32.mrf.mxu0 }
 0x439   :  { %1276 = vst [vmem:[#allocation10 + $0x50] sm:$0xff] %v1180_v38  ;;  %v1172_v41 = vadd.f32 %v2208_v9, %v1171_v40 }
 0x43a   :  { %v1730_v25 = vpop.f32.mrf.mxu0 }
 0x43b   :  { %1274 = vst [vmem:[#allocation10 + $0x40] sm:$0xff] %v1172_v41  ;;  %v1183_v42 = vadd.f32 %v1730_v25, %v2208_v9 }
 0x43c   :  { %v1174_v3 = vpop.f32.mrf.mxu0 }
 0x43d   :  { %1277 = vst [vmem:[#allocation10 + $0x58] sm:$0xff] %v1183_v42  ;;  %v1175_v15 = vadd.f32 %v2208_v9, %v1174_v3 }
 0x43f   :  { %1275 = vst [vmem:[#allocation10 + $0x48] sm:$0xff] %v1175_v15 }
 0x446   :  { %v1733_v21 = vpop.f32.mrf.mxu0 }
 0x447   :  { %v1196_v62 = vadd.f32 %v1733_v21, %v2208_v9 }
 0x448   :  { %v1187_v10 = vpop.f32.mrf.mxu0 }
 0x449   :  { %1280 = vst [vmem:[#allocation10 + $0x70] sm:$0xff] %v1196_v62  ;;  %v1188_v43 = vadd.f32 %v2208_v9, %v1187_v10 }
 0x44a   :  { %v1734_v50 = vpop.f32.mrf.mxu0 }
 0x44b   :  { %1278 = vst [vmem:[#allocation10 + $0x60] sm:$0xff] %v1188_v43  ;;  %v1199_v51 = vadd.f32 %v1734_v50, %v2208_v9 }
 0x44c   :  { %v1190_v49 = vpop.f32.mrf.mxu0 }
 0x44d   :  { %1281 = vst [vmem:[#allocation10 + $0x78] sm:$0xff] %v1199_v51  ;;  %v1191_v54 = vadd.f32 %v2208_v9, %v1190_v49 }
 0x44f   :  { %1279 = vst [vmem:[#allocation10 + $0x68] sm:$0xff] %v1191_v54 }
 0x456   :  { %v1737_v52 = vpop.f32.mrf.mxu0 }
 0x457   :  { %v1212_v55 = vadd.f32 %v1737_v52, %v2208_v9 }
 0x458   :  { %v1203_v48 = vpop.f32.mrf.mxu0 }
 0x459   :  { %1284 = vst [vmem:[#allocation10 + $0x90] sm:$0xff] %v1212_v55  ;;  %v1204_v47 = vadd.f32 %v2208_v9, %v1203_v48 }
 0x45a   :  { %v1738_v4 = vpop.f32.mrf.mxu0 }
 0x45b   :  { %1282 = vst [vmem:[#allocation10 + $0x80] sm:$0xff] %v1204_v47  ;;  %v1215_v6 = vadd.f32 %v1738_v4, %v2208_v9 }
 0x45c   :  { %v1206_v57 = vpop.f32.mrf.mxu0 }
 0x45d   :  { %1285 = vst [vmem:[#allocation10 + $0x98] sm:$0xff] %v1215_v6  ;;  %v1207_v46 = vadd.f32 %v2208_v9, %v1206_v57 }
 0x45f   :  { %1283 = vst [vmem:[#allocation10 + $0x88] sm:$0xff] %v1207_v46 }
 0x466   :  { %v1741_v0 = vpop.f32.mrf.mxu0 }
 0x467   :  { %v1228_v2 = vadd.f32 %v1741_v0, %v2208_v9 }
 0x468   :  { %v1219_v7 = vpop.f32.mrf.mxu0 }
 0x469   :  { %1288 = vst [vmem:[#allocation10 + $0xb0] sm:$0xff] %v1228_v2  ;;  %v1220_v45 = vadd.f32 %v2208_v9, %v1219_v7 }
 0x46a   :  { %v1742_v11 = vpop.f32.mrf.mxu0 }
 0x46b   :  { %1286 = vst [vmem:[#allocation10 + $0xa0] sm:$0xff] %v1220_v45  ;;  %v1231_v44 = vadd.f32 %v1742_v11, %v2208_v9 }
 0x46c   :  { %v1222_v5 = vpop.f32.mrf.mxu0 }
 0x46d   :  { %1289 = vst [vmem:[#allocation10 + $0xb8] sm:$0xff] %v1231_v44  ;;  %v1223_v12 = vadd.f32 %v2208_v9, %v1222_v5 }
 0x46f   :  { %1287 = vst [vmem:[#allocation10 + $0xa8] sm:$0xff] %v1223_v12 }
 0x476   :  { %v1745_v22 = vpop.f32.mrf.mxu0 }
 0x477   :  { %v1244_v58 = vadd.f32 %v1745_v22, %v2208_v9 }
 0x478   :  { %v1235_v8 = vpop.f32.mrf.mxu0 }
 0x479   :  { %1292 = vst [vmem:[#allocation10 + $0xd0] sm:$0xff] %v1244_v58  ;;  %v1236_v39 = vadd.f32 %v2208_v9, %v1235_v8 }
 0x47a   :  { %v1746_v60 = vpop.f32.mrf.mxu0 }
 0x47b   :  { %1290 = vst [vmem:[#allocation10 + $0xc0] sm:$0xff] %v1236_v39  ;;  %v1247_v63 = vadd.f32 %v1746_v60, %v2208_v9 }
 0x47c   :  { %v1238_v23 = vpop.f32.mrf.mxu0 }
 0x47d   :  { %1293 = vst [vmem:[#allocation10 + $0xd8] sm:$0xff] %v1247_v63  ;;  %v1239_v59 = vadd.f32 %v2208_v9, %v1238_v23 }
 0x47f   :  { %1291 = vst [vmem:[#allocation10 + $0xc8] sm:$0xff] %v1239_v59 }
 0x486   :  { %v1749_v16 = vpop.f32.mrf.mxu0 }
 0x487   :  { %v1260_v13 = vadd.f32 %v1749_v16, %v2208_v9 }
 0x488   :  { %v1251_v56 = vpop.f32.mrf.mxu0 }
 0x489   :  { %1296 = vst [vmem:[#allocation10 + $0xf0] sm:$0xff] %v1260_v13  ;;  %v1252_v14 = vadd.f32 %v2208_v9, %v1251_v56 }
 0x48a   :  { %v1750_v61 = vpop.f32.mrf.mxu0 }
 0x48b   :  { %1294 = vst [vmem:[#allocation10 + $0xe0] sm:$0xff] %v1252_v14  ;;  %v1263_v53 = vadd.f32 %v1750_v61, %v2208_v9 }
 0x48c   :  { %v1254_v1 = vpop.f32.mrf.mxu0 }
 0x48d   :  { %1297 = vst [vmem:[#allocation10 + $0xf8] sm:$0xff] %v1263_v53  ;;  %v1255_v17 = vadd.f32 %v2208_v9, %v1254_v1 }
 0x48f   :  { %1295 = vst [vmem:[#allocation10 + $0xe8] sm:$0xff] %v1255_v17 }
 0x490   :  { %1931 = shalt.err (!%p1928_p10)
}
 0x491   :  { %1309 = dma.vmem_to_hbm [thread:$0]  %s1304_s20, 4096, %s2254_s6, [#allocation4], %s1952_s7, %s1952_s7, %s1953_s8  }
 0x492   :  { %1946 = dma.done.wait [#allocation4], 4096  }
 0x493   :  { %1947 = vsyncadd [#allocation4], 4294963200 }
 0x494   :  { %1313 = vsyncpa [#allocation3], 1 }
 0x495   :  { %1314 = vsyncpa [#allocation6], 1 }
 0x496   :  { %1315 = vsyncpa [#allocation9], 1 }
 0x497   :  { %1316 = vsyncpa [#allocation4], 1 }

</bundles_post_ra>
